<compile_context>
chip_gen: v7x
topology: tpu7x:2x2x1
jax: 0.10.0
libtpu: 0.0.40
codegen_flags: <defaults>
</compile_context>

<pallas_src>
import functools

import numpy as np
import jax
import jax.numpy as jnp
from jax import lax
from jax.experimental import pallas as pl
from jax.experimental.pallas import tpu as pltpu


def _round_up(x, m):
    return ((x + m - 1) // m) * m


def _cdiv(a, b):
    return (a + b - 1) // b


def _vmem_capacity_bytes():
    try:
        return int(pltpu.get_tpu_info().vmem_capacity_bytes)
    except Exception:
        return 64 * 1024 * 1024   # conservative (v7x)


def _vmem_estimate(tb, feat_dim, itemsize, p_pad):
    """Rough per-step VMEM working set: double-buffered inputs, resident outputs and the
    on-chip one-hot / iota / f32 intermediates."""
    feat = 2 * tb * feat_dim * itemsize                     # feature tiles (double buffer)
    pidx = 2 * 8 * tb * 4                                   # [1, tb] int32 padded to 8 sublanes
    outs = 2 * (p_pad * feat_dim * 4 + 8 * max(feat_dim, 128) * 4)   # csum + ssq blocks
    inter = p_pad * tb * (itemsize + 5)                     # one-hot + iota + bool compare
    inter += 2 * tb * feat_dim * 4                          # f32 upcast + squares
    return feat + pidx + outs + inter


def _choose_batch_tile(batch, feat_dim, itemsize, p_pad, vmem_cap):
    """Batch-tile size: multiple of 128 (lane-aligned for the [1, TB] index row) unless a
    single 8-aligned tile covers the whole batch.  Targets ~8 MiB feature tiles on
    128 MiB-VMEM chips (v5e/v6e) and ~4 MiB on v7x, and shrinks until the full working
    set (including the one-hot intermediates) fits comfortably."""
    big = vmem_cap >= 96 * 1024 * 1024
    budget = int(vmem_cap * 0.6)
    tb_cap = 8192 if big else 2048

    tb_full = _round_up(max(batch, 1), 8)
    if tb_full <= tb_cap and _vmem_estimate(tb_full, feat_dim, itemsize, p_pad) <= budget:
        return tb_full

    target_bytes = (8 if big else 4) * 1024 * 1024
    tb = target_bytes // max(1, feat_dim * itemsize)
    tb = max(128, min(tb_cap, int(tb)))
    tb = (tb // 128) * 128
    while tb > 128 and _vmem_estimate(tb, feat_dim, itemsize, p_pad) > budget:
        tb = max(128, ((tb // 2) // 128) * 128)
    return tb


def _pvil_partial_kernel(pidx_ref, feat_ref, csum_ref, ssq_ref, *,
                         p_pad, batch, tb, tiles_per_shard, needs_mask):
    """One grid step consumes a [TB, D] feature tile and accumulates per-shard partials.

    pidx_ref: [1, TB]     int32 remapped patient index (0..P-1; >= p_pad => padded row)
    feat_ref: [TB, D]     features (last tile may extend past B; masked below)
    csum_ref: [p_pad, D]  per-shard accumulated per-patient feature sums (output, resident)
    ssq_ref:  [1, D]      per-shard accumulated per-lane sum of squared features (output)
    """
    shard = pl.program_id(0)
    step = pl.program_id(1)

    @pl.when(step == 0)
    def _init():
        csum_ref[...] = jnp.zeros_like(csum_ref)
        ssq_ref[...] = jnp.zeros_like(ssq_ref)

    f = feat_ref[...]                                     # [TB, D]

    if needs_mask:
        # Zero out rows whose *nominal* global index is >= B (ragged last tile and any
        # fully out-of-range shard tile whose feature block index was clamped).
        row0 = (shard * tiles_per_shard + step) * tb
        rows = row0 + lax.broadcasted_iota(jnp.int32, (tb, 1), 0)
        f = jnp.where(rows < batch, f, jnp.zeros_like(f))

    # Transposed one-hot assignment built on-chip in the matmul dtype (single cast).
    onehot = (pidx_ref[...] ==
              lax.broadcasted_iota(jnp.int32, (p_pad, f.shape[0]), 0)).astype(f.dtype)

    # Unnormalized centroid sums: onehot @ f -> [p_pad, D] (single MXU matmul, f32 acc).
    csum_ref[...] += jnp.dot(onehot, f, preferred_element_type=jnp.float32)

    # Global sum of squared features: keep a [1, D] partial (VPU adds + one sublane
    # reduce); the final cross-lane reduce happens once in the wrapper epilogue.
    ff = f.astype(jnp.float32)
    ssq_ref[...] += jnp.sum(ff * ff, axis=0, keepdims=True)


def patient_variance_invariance_loss(features, patient_ids,
                                     lambda_pvr=0.1, lambda_pi=0.1, eps=1e-6,
                                     max_patients=None, batch_tile=None):
    """JAX/Pallas equivalent of PatientVarianceInvarianceLoss.forward (jit-friendly).

    `max_patients` (static) must be >= the number of distinct patient ids in the batch;
    it defaults to the batch size (always safe).  For large batches pass a tight bound —
    the centroid accumulator and the on-chip one-hot scale with it.  Passing a bound that
    is too small silently drops patients (jnp.unique truncation) — the result would be
    wrong, so only tighten it when the bound is known.
    `batch_tile` (static) optionally overrides the batch tile size (testing / tuning).
    """
    features = jnp.asarray(features)
    patient_ids = jnp.asarray(patient_ids).reshape(-1)
    B, D = features.shape

    p_max = int(max_patients) if max_patients is not None else B
    p_pad = _round_up(max(p_max, 1), 8)

    # On-device remap of raw patient ids to contiguous indices 0..P-1 (no host sync,
    # works under jit).  Unused slots simply end up with count 0.
    _, inverse = jnp.unique(patient_ids, size=p_max, return_inverse=True)
    inverse = inverse.astype(jnp.int32).reshape(-1)

    itemsize = jnp.dtype(features.dtype).itemsize
    vmem_cap = _vmem_capacity_bytes()
    if batch_tile is not None:
        tb = int(batch_tile)
        tb = _round_up(B, 8) if tb >= B else max(128, (tb // 128) * 128)
    else:
        tb = _choose_batch_tile(B, D, itemsize, p_pad, vmem_cap)

    num_tiles = _cdiv(B, tb)
    # Leading "parallel" axis: lets v7x's two TensorCores each stream half the tiles
    # (single-TC v5e/v6e just run the shards sequentially — same total work).
    shards = 2 if num_tiles >= 2 else 1
    tiles_per_shard = _cdiv(num_tiles, shards)
    covered = shards * tiles_per_shard * tb
    needs_mask = covered != B

    # Only the tiny int32 patient-index row is padded; pad value p_pad is out of range,
    # so padded rows produce an all-zero one-hot column.  Features are NOT copied/padded.
    pidx = jnp.full((covered,), p_pad, jnp.int32).at[:B].set(inverse)
    pidx2d = pidx.reshape(1, covered)

    # Per-patient counts in the wrapper (removes the per-tile XLU row-reduce + scratch).
    counts = jnp.zeros((p_pad,), jnp.float32).at[inverse].add(1.0)

    kernel = functools.partial(
        _pvil_partial_kernel, p_pad=p_pad, batch=B, tb=tb,
        tiles_per_shard=tiles_per_shard, needs_mask=needs_mask)

    est = _vmem_estimate(tb, D, itemsize, p_pad)
    cap_limit = min(100 * 1024 * 1024, int(vmem_cap * 0.8))   # headroom on v7x's 64 MiB
    vmem_limit = int(min(cap_limit, max(32 * 1024 * 1024, int(1.3 * est) + (2 << 20))))

    nt = num_tiles
    tps = tiles_per_shard

    # Feature block index is clamped to the last real block; fully out-of-range shard
    # tiles therefore re-read valid data whose contribution is zeroed by the row mask.
    csum_parts, ssq_parts = pl.pallas_call(
        kernel,
        out_shape=(jax.ShapeDtypeStruct((shards, p_pad, D), jnp.float32),
                   jax.ShapeDtypeStruct((shards, 1, D), jnp.float32)),
        grid_spec=pltpu.PrefetchScalarGridSpec(
            num_scalar_prefetch=0,
            grid=(shards, tiles_per_shard),
            in_specs=[
                pl.BlockSpec((1, tb), lambda c, i: (0, c * tps + i)),          # patient idx
                pl.BlockSpec((tb, D),
                             lambda c, i: (jnp.minimum(c * tps + i, nt - 1), 0)),  # features
            ],
            out_specs=[
                pl.BlockSpec((None, p_pad, D), lambda c, i: (c, 0, 0)),        # csum partial
                pl.BlockSpec((None, 1, D), lambda c, i: (c, 0, 0)),            # ssq partial
            ]),
        compiler_params=pltpu.CompilerParams(
            dimension_semantics=("parallel", "arbitrary"),
            vmem_limit_bytes=vmem_limit),
    )(pidx2d, features)

    # ---- Tiny O(P*D) epilogue in XLA (combine shard partials, centroids, loss). ----
    csum = jnp.sum(csum_parts, axis=0)                      # [p_pad, D]
    ssq = jnp.sum(ssq_parts)                                # scalar

    valid = counts > 0.5                                    # [p_pad]
    num_p = jnp.sum(valid.astype(jnp.float32))
    safe_counts = jnp.where(valid, counts, 1.0)
    centroids = csum / safe_counts[:, None]                 # padded rows stay 0
    cent_sq = jnp.sum(centroids * centroids, axis=1)        # [p_pad]

    # TODO(synk): sum-of-squares / pairwise-distance identities can lose precision when
    # features carry a large common offset; subtract a reference mean before squaring in
    # that regime.
    within = jnp.maximum(ssq - jnp.sum(counts * cent_sq), 0.0)
    sum_c = jnp.sum(centroids, axis=0)                      # [D]
    between = jnp.maximum(num_p * jnp.sum(cent_sq) - jnp.sum(sum_c * sum_c), 0.0)
    loss_pvr = within / (between + eps)

    den = jnp.maximum(num_p, 1.0)
    g = sum_c / den
    diff = centroids - g[None, :]
    loss_pi = jnp.sum(jnp.where(valid, jnp.sum(diff * diff, axis=1), 0.0)) / den

    total = lambda_pvr * loss_pvr + lambda_pi * loss_pi
    # <= 1 distinct patient -> 0.0 (matches the PyTorch early-return).
    return jnp.where(num_p > 1.5, total, jnp.zeros_like(total))
    # TODO(synk): for batches with thousands of distinct patients, add a p-tiled grid axis
    # so the [P, D] accumulator does not have to be VMEM-resident in one piece.


def _reference_loss(features, patient_ids, lambda_pvr=0.1, lambda_pi=0.1, eps=1e-6):
    """NumPy reference following the PyTorch loop structure exactly."""
    feats = np.asarray(jax.device_get(features), dtype=np.float32)
    pids = np.asarray(jax.device_get(patient_ids))
    unique = np.unique(pids)
    if unique.shape[0] <= 1:
        return 0.0
    within = 0.0
    centroids = []
    for pid in unique:
        fp = feats[pids == pid]
        c = fp.mean(axis=0)
        centroids.append(c)
        within += np.sum((fp - c) ** 2)
    centroids = np.stack(centroids, axis=0)
    between = 0.0
    P = centroids.shape[0]
    for i in range(P):
        for j in range(i + 1, P):
            between += np.sum((centroids[i] - centroids[j]) ** 2)
    loss_pvr = within / (between + eps)
    g = centroids.mean(axis=0)
    loss_pi = np.mean(np.sum((centroids - g) ** 2, axis=1))
    return lambda_pvr * loss_pvr + lambda_pi * loss_pi


if __name__ == "__main__":
    key = jax.random.PRNGKey(0)
    k1, k2, k3 = jax.random.split(key, 3)

    # Case 1: tiny dense case (single tile, no masking).
    B, D = 8, 32
    features = jax.random.normal(k1, (B, D), dtype=jnp.float32)
    patient_ids = jnp.array([0, 0, 1, 1, 2, 2, 3, 3], dtype=jnp.int32)
    loss_fn = jax.jit(functools.partial(patient_variance_invariance_loss,
                                        lambda_pvr=0.1, lambda_pi=0.1))
    loss = jax.block_until_ready(loss_fn(features, patient_ids))
    ref = _reference_loss(features, patient_ids, 0.1, 0.1)
    assert np.allclose(float(loss), float(ref), rtol=1e-4, atol=1e-5), (float(loss), float(ref))

    # Case 2: a single patient must return exactly 0.0 (PyTorch early-return).
    loss_single = jax.block_until_ready(loss_fn(features, jnp.zeros((B,), jnp.int32)))
    assert float(loss_single) == 0.0, float(loss_single)

    # Case 3: multi-tile / two-shard / ragged-tail path (forced small tile + tight P bound).
    B2, D2 = 384, 16
    feats2 = jax.random.normal(k2, (B2, D2), dtype=jnp.float32)
    pids2 = jax.random.randint(k3, (B2,), 0, 7, dtype=jnp.int32)
    loss_fn2 = jax.jit(functools.partial(patient_variance_invariance_loss,
                                         lambda_pvr=0.1, lambda_pi=0.1,
                                         max_patients=16, batch_tile=128))
    loss2 = jax.block_until_ready(loss_fn2(feats2, pids2))
    ref2 = _reference_loss(feats2, pids2, 0.1, 0.1)
    assert np.allclose(float(loss2), float(ref2), rtol=1e-3, atol=1e-5), (float(loss2), float(ref2))

    print("KERNEL_OK")
</pallas_src>

<mosaic_0001>
module attributes {stable_mosaic.version = 11 : i64} {
  func.func @_pvil_partial_kernel(%arg0: i32, %arg1: i32, %arg2: memref<1x8xi32, #tpu.memory_space<vmem>>, %arg3: memref<8x32xf32, #tpu.memory_space<vmem>>, %arg4: memref<1x8x32xf32, #tpu.memory_space<vmem>>, %arg5: memref<1x1x32xf32, #tpu.memory_space<vmem>>) attributes {dimension_semantics = [#tpu.dimension_semantics<parallel>, #tpu.dimension_semantics<arbitrary>], iteration_bounds = array<i64: 1, 1>, scalar_prefetch = 0 : i64, scratch_operands = 0 : i64, tpu.core_type = #tpu.core_type<tc>, window_params = [{transform_indices = @transform_0, window_bounds = array<i64: 1, 8>}, {transform_indices = @transform_1, window_bounds = array<i64: 8, 32>}, {transform_indices = @transform_2, window_bounds = array<i64: 1, 8, 32>}, {transform_indices = @transform_3, window_bounds = array<i64: 1, 1, 32>}]} {
    %c0_i32 = arith.constant 0 : i32
    %0 = arith.cmpi eq, %arg1, %c0_i32 : i32
    %1 = arith.extui %0 : i1 to i32
    %c0_i32_0 = arith.constant 0 : i32
    %2 = arith.cmpi ne, %1, %c0_i32_0 : i32
    scf.if %2 {
      %cst_17 = arith.constant 0.000000e+00 : f32
      %26 = vector.broadcast %cst_17 : f32 to vector<8x32xf32>
      %c0_18 = arith.constant 0 : index
      %c0_19 = arith.constant 0 : index
      %c0_20 = arith.constant 0 : index
      %27 = vector.load %arg4[%c0_18, %c0_19, %c0_20] : memref<1x8x32xf32, #tpu.memory_space<vmem>>, vector<1x8x32xf32>
      %28 = vector.shape_cast %27 : vector<1x8x32xf32> to vector<8x32xf32>
      %29 = vector.shape_cast %26 : vector<8x32xf32> to vector<1x8x32xf32>
      tpu.vector_store %arg4[%c0_18, %c0_19, %c0_20], %29 {strides = array<i32>} : memref<1x8x32xf32, #tpu.memory_space<vmem>>, vector<1x8x32xf32>,
      %cst_21 = arith.constant 0.000000e+00 : f32
      %30 = vector.broadcast %cst_21 : f32 to vector<1x32xf32>
      %c0_22 = arith.constant 0 : index
      %c0_23 = arith.constant 0 : index
      %c0_24 = arith.constant 0 : index
      %31 = vector.load %arg5[%c0_22, %c0_23, %c0_24] : memref<1x1x32xf32, #tpu.memory_space<vmem>>, vector<1x1x32xf32>
      %32 = vector.shape_cast %31 : vector<1x1x32xf32> to vector<1x32xf32>
      %33 = vector.shape_cast %30 : vector<1x32xf32> to vector<1x1x32xf32>
      tpu.vector_store %arg5[%c0_22, %c0_23, %c0_24], %33 {strides = array<i32>} : memref<1x1x32xf32, #tpu.memory_space<vmem>>, vector<1x1x32xf32>,
    } else {
    }
    %c0 = arith.constant 0 : index
    %c0_1 = arith.constant 0 : index
    %3 = vector.load %arg3[%c0, %c0_1] : memref<8x32xf32, #tpu.memory_space<vmem>>, vector<8x32xf32>
    %c0_2 = arith.constant 0 : index
    %c0_3 = arith.constant 0 : index
    %4 = vector.load %arg2[%c0_2, %c0_3] : memref<1x8xi32, #tpu.memory_space<vmem>>, vector<1x8xi32>
    %5 = tpu.iota {dimensions = array<i32: 0>} : vector<8x8xi32>
    %6 = vector.broadcast %4 : vector<1x8xi32> to vector<8x8xi32>
    %7 = arith.cmpi eq, %6, %5 : vector<8x8xi32>
    %8 = arith.extui %7 : vector<8x8xi1> to vector<8x8xi32>
    %9 = arith.sitofp %8 : vector<8x8xi32> to vector<8x8xf32>
    %c0_4 = arith.constant 0 : index
    %c0_5 = arith.constant 0 : index
    %c0_6 = arith.constant 0 : index
    %10 = vector.load %arg4[%c0_4, %c0_5, %c0_6] : memref<1x8x32xf32, #tpu.memory_space<vmem>>, vector<1x8x32xf32>
    %11 = vector.shape_cast %10 : vector<1x8x32xf32> to vector<8x32xf32>
    %cst = arith.constant dense<0.000000e+00> : vector<8x32xf32>
    %12 = tpu.matmul %9, %3, %cst {dimension_numbers = #tpu.dot_dimension_numbers<[1], [0], [0], [1], [0, 0, 1, 1], [], []>} : vector<8x8xf32>, vector<8x32xf32>, vector<8x32xf32> -> vector<8x32xf32>
    %13 = arith.addf %11, %12 : vector<8x32xf32>
    %c0_7 = arith.constant 0 : index
    %c0_8 = arith.constant 0 : index
    %c0_9 = arith.constant 0 : index
    %14 = vector.load %arg4[%c0_7, %c0_8, %c0_9] : memref<1x8x32xf32, #tpu.memory_space<vmem>>, vector<1x8x32xf32>
    %15 = vector.shape_cast %14 : vector<1x8x32xf32> to vector<8x32xf32>
    %16 = vector.shape_cast %13 : vector<8x32xf32> to vector<1x8x32xf32>
    tpu.vector_store %arg4[%c0_7, %c0_8, %c0_9], %16 {strides = array<i32>} : memref<1x8x32xf32, #tpu.memory_space<vmem>>, vector<1x8x32xf32>,
    %c0_10 = arith.constant 0 : index
    %c0_11 = arith.constant 0 : index
    %c0_12 = arith.constant 0 : index
    %17 = vector.load %arg5[%c0_10, %c0_11, %c0_12] : memref<1x1x32xf32, #tpu.memory_space<vmem>>, vector<1x1x32xf32>
    %18 = vector.shape_cast %17 : vector<1x1x32xf32> to vector<1x32xf32>
    %19 = arith.mulf %3, %3 : vector<8x32xf32>
    %cst_13 = arith.constant dense<0.000000e+00> : vector<32xf32>
    %20 = vector.multi_reduction <add>, %19, %cst_13 [0] : vector<8x32xf32> to vector<32xf32>
    %21 = vector.shape_cast %20 : vector<32xf32> to vector<1x32xf32>
    %22 = arith.addf %18, %21 : vector<1x32xf32>
    %c0_14 = arith.constant 0 : index
    %c0_15 = arith.constant 0 : index
    %c0_16 = arith.constant 0 : index
    %23 = vector.load %arg5[%c0_14, %c0_15, %c0_16] : memref<1x1x32xf32, #tpu.memory_space<vmem>>, vector<1x1x32xf32>
    %24 = vector.shape_cast %23 : vector<1x1x32xf32> to vector<1x32xf32>
    %25 = vector.shape_cast %22 : vector<1x32xf32> to vector<1x1x32xf32>
    tpu.vector_store %arg5[%c0_14, %c0_15, %c0_16], %25 {strides = array<i32>} : memref<1x1x32xf32, #tpu.memory_space<vmem>>, vector<1x1x32xf32>,
    return
  }
  func.func @transform_0(%arg0: i32, %arg1: i32) -> (i32, i32) {
    %c1_i32 = arith.constant 1 : i32
    %0 = arith.muli %arg0, %c1_i32 : i32
    %1 = arith.addi %0, %arg1 : i32
    %c0_i32 = arith.constant 0 : i32
    %c0_i32_0 = arith.constant 0 : i32
    return %c0_i32, %1 : i32, i32
  }
  func.func @transform_1(%arg0: i32, %arg1: i32) -> (i32, i32) {
    %c1_i32 = arith.constant 1 : i32
    %0 = arith.muli %arg0, %c1_i32 : i32
    %1 = arith.addi %0, %arg1 : i32
    %c0_i32 = arith.constant 0 : i32
    %2 = arith.minsi %1, %c0_i32 : i32
    %c0_i32_0 = arith.constant 0 : i32
    %c0_i32_1 = arith.constant 0 : i32
    return %2, %c0_i32_0 : i32, i32
  }
  func.func @transform_2(%arg0: i32, %arg1: i32) -> (i32, i32, i32) {
    %c0_i32 = arith.constant 0 : i32
    %c0_i32_0 = arith.constant 0 : i32
    %c0_i32_1 = arith.constant 0 : i32
    return %arg0, %c0_i32, %c0_i32_0 : i32, i32, i32
  }
  func.func @transform_3(%arg0: i32, %arg1: i32) -> (i32, i32, i32) {
    %c0_i32 = arith.constant 0 : i32
    %c0_i32_0 = arith.constant 0 : i32
    %c0_i32_1 = arith.constant 0 : i32
    return %arg0, %c0_i32, %c0_i32_0 : i32, i32, i32
  }
}

</mosaic_0001>

<bundles_post_ra>
// kernel: patient_variance_invariance_loss.1
= control target key start
LH: loop header
LB: loop body
LE: loop exit
PB: predicated region body
PF: predicated region fallthrough
CT: control target
= control target key end

     0   :  { %vm60_vm0 = vcmask 253952   ;;  %vm58_vm1 = vcmask 261120   ;;  %v192_v0 = vmov 0.0   ;;  %vm193_vm2 = vmmov 0   ;;  %s243_s3 = inlined_call_operand.vmem [shape: f32[1,1,32], index: 3, kind: output, shape index: {1}]   ;;  %s244_s1 = inlined_call_operand.vmem [shape: f32[8,32], index: 1, kind: input, shape index: {}]   ;;  %s245_s0 = inlined_call_operand.vmem [shape: s32[1,8], index: 0, kind: input, shape index: {}]   ;;  %s246_s2 = inlined_call_operand.vmem [shape: f32[1,8,32], index: 2, kind: output, shape index: {0}]  }
   0x1   :  { %61 = vst.msk [vmem:[%s243_s3] sm:$0x1] %vm60_vm0, %v192_v0  ;;  %185 = vmatprep.subr.mxu0 %v192_v0  ;;  %v62_v1 = vld [vmem:[%s244_s1] sm:$0xff]  ;;  %187 = vmatprep.mubr.msk.f32.mxu0 %vm193_vm2, %v192_v0  ;;  %v64_v2 = vlaneseq  ;;  %vm74_vm3 = vcmask 64512  }
   0x2   :  { %59 = vst.msk [vmem:[%s246_s2] sm:$0xff] %vm58_vm1, %v192_v0  ;;  %186 = vmatpush3.msra.mxu0 %v62_v1  ;;  %v152_v3 = vmul.f32 %v62_v1, %v62_v1  ;;  %v180_v4 = vld [vmem:[%s245_s0] ss:$0 sm:$0xff] }
   0x3   :  { %v65_v5 = vshrl.u32 %v64_v2, 7 }
   0x4   :  { %v153_v6 = vsel %vm58_vm1, %v152_v3, 0.0 }
   0x5   :  { %v154_v7 = vrot.slane %v153_v6, 4  ;;  %vm70_vm4 = vcmp.eq.s32.totalorder %v180_v4, %v65_v5 }
   0x6   :  { %v181_v8 = vsel %vm70_vm4, 1.0, %v192_v0 }
   0x7   :  { %v155_v9 = vadd.f32 %v154_v7, %v153_v6  ;;  %188 = vmatmul.mubr.msk.f32.vlgmr.msra.gmra.mrb[0].mxu0 %vm74_vm3, %v181_v8 }
   0x8   :  { %v151_v13 = vld [vmem:[%s243_s3] sm:$0x1] }
   0x9   :  { %v156_v10 = vrot.slane %v155_v9, 2  ;;  %v73_v16 = vld [vmem:[%s246_s2] sm:$0xff] }
   0xb   :  { %v157_v11 = vadd.f32 %v156_v10, %v155_v9 }
   0xd   :  { %v158_v12 = vrot.slane %v157_v11, 1 }
   0xf   :  { %v159_v14 = vadd.f32 %v158_v12, %v157_v11 }
  0x11   :  { %v160_v15 = vadd.f32 %v159_v14, %v151_v13 }
  0x13   :  { %162 = vst.msk [vmem:[%s243_s3] sm:$0x1] %vm60_vm0, %v160_v15 }
  0xda   :  { %v144_v17 = vpop.f32.mrb[0].mxu0 }
  0xdb   :  { %v148_v18 = vadd.f32 %v144_v17, %v73_v16  ;;  %v189_v19 = vpop.f32.mrb[1].mxu0 }
  0xdd   :  { %150 = vst.msk [vmem:[%s246_s2] sm:$0xff] %vm58_vm1, %v148_v18 }

</bundles_post_ra>
